<compile_context>
chip_gen: v7x
topology: tpu7x:2x2x1
jax: 0.10.0
libtpu: 0.0.40
codegen_flags: <defaults>
</compile_context>

<pallas_src>
import functools

import jax
import jax.numpy as jnp
from jax.experimental import pallas as pl
from jax.experimental.pallas import tpu as pltpu

K = 3  # number of nearest neighbors, matches FPModule(k=3, ...)


def _round_up(v, m):
    return ((v + m - 1) // m) * m


def _fp_kernel(fold_w1a, precise,
               pos_skip_ref, bskip_ref, xskip_ref,          # tiled over M
               pos_t_ref, bsrc_ref, feat_ref,               # resident (source level)
               w1a_ref, w1b_ref, b1_ref, w2_ref, b2_ref,    # resident (MLP weights)
               out_ref):
    big = jnp.float32(1e30)

    # Pairwise squared distances with the cross-batch mask folded into the init
    # (saves one full (tM,N) select pass); int32 batch-id compare.
    same_batch = bskip_ref[...] == bsrc_ref[...]             # (tM, N) bool
    d2 = jnp.where(same_batch, jnp.float32(0.0), big)        # (tM, N)
    ps = pos_skip_ref[...]                                    # (tM, 3)
    pt = pos_t_ref[...]                                       # (3,  N)
    for c in range(3):                                        # VPU broadcast FMAs
        diff = ps[:, c:c + 1] - pt[c:c + 1, :]
        d2 = d2 + diff * diff

    def recip(v):
        return (1.0 / v) if precise else pl.reciprocal(v, approx=True)

    # k-NN inverse-squared-distance weights.  Per k: one lane-min (XLU), one
    # (tM,1) reciprocal (EUP), two (tM,N) select passes.  den is accumulated
    # in-loop so wsum is only ever read once, by the gather matmul below.
    wsum = jnp.zeros_like(d2)
    den = jnp.zeros((d2.shape[0], 1), jnp.float32)
    for k in range(K):
        dmin = jnp.min(d2, axis=1, keepdims=True)                     # (tM, 1)
        sel = d2 <= dmin                                              # (tM, N)
        wk = recip(jnp.maximum(dmin, jnp.float32(1e-16)))             # (tM, 1)
        wsum = wsum + jnp.where(sel, wk, jnp.float32(0.0))
        den = den + wk
        if k + 1 < K:
            d2 = jnp.where(sel, big, d2)                              # drop picked pts

    # Gather all K neighbors with ONE MXU matmul.  Kept f32: the weights are the
    # numerically sensitive operand.
    # TODO(synk): for very large N / c_in, cast wsum & feat to bf16 here as well.
    num = jnp.dot(wsum, feat_ref[...], preferred_element_type=jnp.float32)
    inv_den = recip(jnp.maximum(den, jnp.float32(1e-30)))    # guards padded tail rows

    # cat([y, x_skip]) @ W1 + b1  ==  y @ W1a + x_skip @ W1b + b1
    mm = jnp.float32 if precise else jnp.bfloat16            # MLP MXU operand dtype
    xs = xskip_ref[...].astype(mm)
    skip_term = jnp.dot(xs, w1b_ref[...].astype(mm),
                        preferred_element_type=jnp.float32)
    if fold_w1a:
        # W1a was folded into the source features in the wrapper (feat = x @ W1a),
        # so num * (1/den) already equals y @ W1a.
        h = num * inv_den + skip_term + b1_ref[...]
    else:
        y = (num * inv_den).astype(mm)
        h = (jnp.dot(y, w1a_ref[...].astype(mm),
                     preferred_element_type=jnp.float32)
             + skip_term + b1_ref[...])
    h = jnp.maximum(h, 0.0)                                   # ReLU
    out_ref[...] = (jnp.dot(h.astype(mm), w2_ref[...].astype(mm),
                            preferred_element_type=jnp.float32)
                    + b2_ref[...])


def _vmem_bytes(tm, n, c_feat, c_in, c_skip, hid_p, c_out_p):
    f = 4  # f32 / int32
    # resident operands (double-buffered by the pipeline; constant index maps)
    resident = 2 * f * (n * (3 + 1 + c_feat)
                        + c_in * hid_p + c_skip * hid_p + hid_p
                        + hid_p * c_out_p + c_out_p)
    # double-buffered M tiles (inputs + output)
    tiled = 2 * f * tm * (3 + 1 + c_skip + c_out_p)
    # live (tM, N) temporaries in the body: d2, wsum (+ ~2 transients)
    temps = 4 * f * tm * n
    return resident + tiled + temps


@functools.partial(jax.jit, static_argnames=("tm", "precise"))
def fp_module_forward(x, pos, batch, x_skip, pos_skip, batch_skip, params,
                      *, tm=None, precise=False):
    """Pallas FPModule.forward.  Returns (x_out, pos_skip, batch_skip).

    tm: M-tile size (None = auto from VMEM capacity).
    precise: f32 matmuls + exact divides (default uses bf16 MLP operands and
             EUP approximate reciprocals, f32 accumulation throughout).
    """
    w1a, w1b, b1, w2, b2 = params
    M = pos_skip.shape[0]
    N = pos.shape[0]
    c_in = x.shape[1]
    c_skip = x_skip.shape[1]
    hid = w1a.shape[1]
    c_out = w2.shape[1]

    # Lane-dense padding of hidden/output widths (zero padding is inert through
    # Linear/ReLU/Linear); keeps the HBM store an unmasked vst.
    hid_p = _round_up(hid, 128)
    c_out_p = _round_up(c_out, 128)
    if hid_p != hid:
        w1a = jnp.pad(w1a, ((0, 0), (0, hid_p - hid)))
        w1b = jnp.pad(w1b, ((0, 0), (0, hid_p - hid)))
        b1 = jnp.pad(b1, ((0, 0), (0, hid_p - hid)))
        w2 = jnp.pad(w2, ((0, hid_p - hid), (0, 0)))
    if c_out_p != c_out:
        w2 = jnp.pad(w2, ((0, 0), (0, c_out_p - c_out)))
        b2 = jnp.pad(b2, ((0, 0), (0, c_out_p - c_out)))

    # VMEM budget from the actual part (64 MiB/TC on v7x, 128 MiB on v5e/v6e).
    try:
        vmem_cap = int(pltpu.get_tpu_info().vmem_capacity_bytes)
    except Exception:
        vmem_cap = 64 * 1024 * 1024          # conservative fallback
    budget = int(vmem_cap * 0.75)

    # Fold W1a into the source features when c_in is narrow and the larger
    # resident slab (N, hid_p) still fits comfortably; exact transformation.
    fold_w1a = (c_in < 128) and (2 * 4 * N * hid_p <= budget // 3)
    feat = jnp.dot(x, w1a, preferred_element_type=jnp.float32) if fold_w1a else x
    c_feat = hid_p if fold_w1a else c_in

    # Pick tM against the VMEM budget; guarantee >=2 M tiles so both v7x
    # TensorCores get work via the "parallel" grid axis.
    if tm is None:
        tm = 1024
        while tm > 8 and _vmem_bytes(tm, N, c_feat, c_in, c_skip, hid_p, c_out_p) > budget:
            tm //= 2
    tm = max(8, min(tm, _round_up(pl.cdiv(M, 2), 8)))
    tm = M if tm >= M else (tm // 8) * 8
    grid = (pl.cdiv(M, tm),)

    vmem_limit = max(_vmem_bytes(tm, N, c_feat, c_in, c_skip, hid_p, c_out_p) + (8 << 20),
                     32 << 20)
    vmem_limit = int(min(vmem_limit, int(vmem_cap * 0.9)))

    pos_t = jnp.transpose(pos)                              # (3, N)
    bskip = batch_skip.astype(jnp.int32).reshape(M, 1)      # (M, 1) int32
    bsrc = batch.astype(jnp.int32).reshape(1, N)            # (1, N) int32

    # TODO(synk): for batch-sorted multi-batch clouds, switch the source operands
    # to per-batch slabs via PrefetchScalarGridSpec (scalar-prefetched offsets) to
    # cut the (tM,N) work to (tM,N/B); for N >~ 16K add an inner N-chunk pipeline
    # (two-pass running top-K) instead of keeping the whole source level resident.
    # TODO(synk): mark the resident specs pipeline_mode=pl.Buffered(1) once the
    # target JAX version is confirmed to support single-buffered pallas_call inputs.
    in_specs = [
        pl.BlockSpec((tm, 3),          lambda i: (i, 0)),   # pos_skip   (tiled)
        pl.BlockSpec((tm, 1),          lambda i: (i, 0)),   # batch_skip (tiled)
        pl.BlockSpec((tm, c_skip),     lambda i: (i, 0)),   # x_skip     (tiled)
        pl.BlockSpec((3, N),           lambda i: (0, 0)),   # pos^T      (resident)
        pl.BlockSpec((1, N),           lambda i: (0, 0)),   # batch      (resident)
        pl.BlockSpec((N, c_feat),      lambda i: (0, 0)),   # x (or x@W1a)
        pl.BlockSpec((c_in, hid_p),    lambda i: (0, 0)),   # W1a
        pl.BlockSpec((c_skip, hid_p),  lambda i: (0, 0)),   # W1b
        pl.BlockSpec((1, hid_p),       lambda i: (0, 0)),   # b1
        pl.BlockSpec((hid_p, c_out_p), lambda i: (0, 0)),   # W2
        pl.BlockSpec((1, c_out_p),     lambda i: (0, 0)),   # b2
    ]
    out_specs = pl.BlockSpec((tm, c_out_p), lambda i: (i, 0))

    out_padded = pl.pallas_call(
        functools.partial(_fp_kernel, fold_w1a, precise),
        out_shape=jax.ShapeDtypeStruct((M, c_out_p), jnp.float32),
        grid=grid,
        in_specs=in_specs,
        out_specs=out_specs,
        compiler_params=pltpu.CompilerParams(
            dimension_semantics=("parallel",),
            vmem_limit_bytes=vmem_limit),
    )(pos_skip, bskip, x_skip, pos_t, bsrc, feat, w1a, w1b, b1, w2, b2)

    out = out_padded[:, :c_out] if c_out_p != c_out else out_padded
    return out, pos_skip, batch_skip


def _reference(x, pos, batch, x_skip, pos_skip, batch_skip, params):
    """Pure-JAX f32 reference with the torch knn_interpolate + MLP semantics."""
    w1a, w1b, b1, w2, b2 = params
    big = jnp.float32(1e30)
    d2 = jnp.sum((pos_skip[:, None, :] - pos[None, :, :]) ** 2, axis=-1)
    d2 = jnp.where(batch_skip[:, None] == batch[None, :], d2, big)
    M, N = d2.shape
    iota_n = jnp.arange(N)[None, :]
    num = jnp.zeros((M, x.shape[1]), jnp.float32)
    den = jnp.zeros((M, 1), jnp.float32)
    for _ in range(K):
        dmin = jnp.min(d2, axis=1, keepdims=True)
        is_min = d2 <= dmin
        min_idx = jnp.min(jnp.where(is_min, iota_n, N), axis=1, keepdims=True)
        onehot = (iota_n == min_idx).astype(jnp.float32)
        w = 1.0 / jnp.maximum(dmin, 1e-16)
        num = num + (onehot * w) @ x
        den = den + w
        d2 = jnp.where(onehot > 0, big, d2)
    y = num / den
    h = jnp.maximum(y @ w1a + x_skip @ w1b + b1, 0.0)
    return h @ w2 + b2


if __name__ == "__main__":
    # Small shapes: batch=2 point clouds, 16 coarse (source) points, 32 skip points.
    N_SRC, M_SKIP = 16, 32
    C_IN, C_SKIP, HIDDEN, C_OUT = 8, 4, 32, 16

    key = jax.random.PRNGKey(0)
    k0, k1, k2, k3, k4, k5, k6, k7 = jax.random.split(key, 8)

    x = jax.random.normal(k0, (N_SRC, C_IN), jnp.float32)
    pos = jax.random.normal(k1, (N_SRC, 3), jnp.float32)
    batch = jnp.concatenate([jnp.zeros(N_SRC // 2, jnp.int32),
                             jnp.ones(N_SRC // 2, jnp.int32)])
    x_skip = jax.random.normal(k2, (M_SKIP, C_SKIP), jnp.float32)
    pos_skip = jax.random.normal(k3, (M_SKIP, 3), jnp.float32)
    batch_skip = jnp.concatenate([jnp.zeros(M_SKIP // 2, jnp.int32),
                                  jnp.ones(M_SKIP // 2, jnp.int32)])

    # self.nn = Seq(Lin(C_IN + C_SKIP, HIDDEN), ReLU, Lin(HIDDEN, C_OUT))
    w1 = 0.1 * jax.random.normal(k4, (C_IN + C_SKIP, HIDDEN), jnp.float32)
    w1a, w1b = w1[:C_IN], w1[C_IN:]
    b1 = 0.1 * jax.random.normal(k5, (1, HIDDEN), jnp.float32)
    w2 = 0.1 * jax.random.normal(k6, (HIDDEN, C_OUT), jnp.float32)
    b2 = 0.1 * jax.random.normal(k7, (1, C_OUT), jnp.float32)
    params = (w1a, w1b, b1, w2, b2)

    ref = _reference(x, pos, batch, x_skip, pos_skip, batch_skip, params)

    # Precise mode: f32 matmuls + exact divides — tight check vs the f32 reference.
    out, pos_out, batch_out = fp_module_forward(
        x, pos, batch, x_skip, pos_skip, batch_skip, params, precise=True)
    out = jax.block_until_ready(out)
    assert out.shape == (M_SKIP, C_OUT)
    assert pos_out.shape == pos_skip.shape and batch_out.shape == batch_skip.shape
    assert jnp.allclose(out, ref, atol=1e-4, rtol=1e-4), "precise-mode mismatch"

    # Default (fast) mode: bf16 MLP operands + EUP approximate reciprocals.
    out_fast, _, _ = fp_module_forward(
        x, pos, batch, x_skip, pos_skip, batch_skip, params)
    out_fast = jax.block_until_ready(out_fast)
    assert jnp.allclose(out_fast, ref, atol=5e-2, rtol=5e-2), "fast-mode mismatch"

    print("KERNEL_OK")
</pallas_src>

<mosaic_0001>
module attributes {stable_mosaic.version = 11 : i64} {
  func.func @_fp_kernel(%arg0: i32, %arg1: memref<16x3xf32, #tpu.memory_space<vmem>>, %arg2: memref<16x1xi32, #tpu.memory_space<vmem>>, %arg3: memref<16x4xf32, #tpu.memory_space<vmem>>, %arg4: memref<3x16xf32, #tpu.memory_space<vmem>>, %arg5: memref<1x16xi32, #tpu.memory_space<vmem>>, %arg6: memref<16x128xf32, #tpu.memory_space<vmem>>, %arg7: memref<8x128xf32, #tpu.memory_space<vmem>>, %arg8: memref<4x128xf32, #tpu.memory_space<vmem>>, %arg9: memref<1x128xf32, #tpu.memory_space<vmem>>, %arg10: memref<128x128xf32, #tpu.memory_space<vmem>>, %arg11: memref<1x128xf32, #tpu.memory_space<vmem>>, %arg12: memref<16x128xf32, #tpu.memory_space<vmem>>) attributes {dimension_semantics = [#tpu.dimension_semantics<parallel>], iteration_bounds = array<i64: 2>, scalar_prefetch = 0 : i64, scratch_operands = 0 : i64, tpu.core_type = #tpu.core_type<tc>, window_params = [{transform_indices = @transform_0, window_bounds = array<i64: 16, 3>}, {transform_indices = @transform_1, window_bounds = array<i64: 16, 1>}, {transform_indices = @transform_2, window_bounds = array<i64: 16, 4>}, {pipeline_mode = #tpu.pipeline_mode<synchronous>, transform_indices = @transform_3, window_bounds = array<i64: 3, 16>}, {pipeline_mode = #tpu.pipeline_mode<synchronous>, transform_indices = @transform_4, window_bounds = array<i64: 1, 16>}, {pipeline_mode = #tpu.pipeline_mode<synchronous>, transform_indices = @transform_5, window_bounds = array<i64: 16, 128>}, {pipeline_mode = #tpu.pipeline_mode<synchronous>, transform_indices = @transform_6, window_bounds = array<i64: 8, 128>}, {pipeline_mode = #tpu.pipeline_mode<synchronous>, transform_indices = @transform_7, window_bounds = array<i64: 4, 128>}, {pipeline_mode = #tpu.pipeline_mode<synchronous>, transform_indices = @transform_8, window_bounds = array<i64: 1, 128>}, {pipeline_mode = #tpu.pipeline_mode<synchronous>, transform_indices = @transform_9, window_bounds = array<i64: 128, 128>}, {pipeline_mode = #tpu.pipeline_mode<synchronous>, transform_indices = @transform_10, window_bounds = array<i64: 1, 128>}, {transform_indices = @transform_11, window_bounds = array<i64: 16, 128>}]} {
    %c0 = arith.constant 0 : index
    %c0_0 = arith.constant 0 : index
    %0 = vector.load %arg2[%c0, %c0_0] : memref<16x1xi32, #tpu.memory_space<vmem>>, vector<16x1xi32>
    %c0_1 = arith.constant 0 : index
    %c0_2 = arith.constant 0 : index
    %1 = vector.load %arg5[%c0_1, %c0_2] : memref<1x16xi32, #tpu.memory_space<vmem>>, vector<1x16xi32>
    %2 = vector.broadcast %0 : vector<16x1xi32> to vector<16x16xi32>
    %3 = vector.broadcast %1 : vector<1x16xi32> to vector<16x16xi32>
    %4 = arith.cmpi eq, %2, %3 : vector<16x16xi32>
    %cst = arith.constant 0.000000e+00 : f32
    %cst_3 = arith.constant 1.000000e+30 : f32
    %5 = vector.broadcast %cst : f32 to vector<16x16xf32>
    %6 = vector.broadcast %cst_3 : f32 to vector<16x16xf32>
    %7 = arith.select %4, %5, %6 : vector<16x16xi1>, vector<16x16xf32>
    %c0_4 = arith.constant 0 : index
    %c0_5 = arith.constant 0 : index
    %8 = vector.load %arg1[%c0_4, %c0_5] : memref<16x3xf32, #tpu.memory_space<vmem>>, vector<16x3xf32>
    %c0_6 = arith.constant 0 : index
    %c0_7 = arith.constant 0 : index
    %9 = vector.load %arg4[%c0_6, %c0_7] : memref<3x16xf32, #tpu.memory_space<vmem>>, vector<3x16xf32>
    %10 = vector.extract_strided_slice %8 {offsets = [0, 0], sizes = [16, 1], strides = [1, 1]} : vector<16x3xf32> to vector<16x1xf32>
    %11 = vector.extract_strided_slice %9 {offsets = [0, 0], sizes = [1, 16], strides = [1, 1]} : vector<3x16xf32> to vector<1x16xf32>
    %12 = vector.broadcast %10 : vector<16x1xf32> to vector<16x16xf32>
    %13 = vector.broadcast %11 : vector<1x16xf32> to vector<16x16xf32>
    %14 = arith.subf %12, %13 : vector<16x16xf32>
    %15 = arith.mulf %14, %14 : vector<16x16xf32>
    %16 = arith.addf %7, %15 : vector<16x16xf32>
    %17 = vector.extract_strided_slice %8 {offsets = [0, 1], sizes = [16, 1], strides = [1, 1]} : vector<16x3xf32> to vector<16x1xf32>
    %18 = vector.extract_strided_slice %9 {offsets = [1, 0], sizes = [1, 16], strides = [1, 1]} : vector<3x16xf32> to vector<1x16xf32>
    %19 = vector.broadcast %17 : vector<16x1xf32> to vector<16x16xf32>
    %20 = vector.broadcast %18 : vector<1x16xf32> to vector<16x16xf32>
    %21 = arith.subf %19, %20 : vector<16x16xf32>
    %22 = arith.mulf %21, %21 : vector<16x16xf32>
    %23 = arith.addf %16, %22 : vector<16x16xf32>
    %24 = vector.extract_strided_slice %8 {offsets = [0, 2], sizes = [16, 1], strides = [1, 1]} : vector<16x3xf32> to vector<16x1xf32>
    %25 = vector.extract_strided_slice %9 {offsets = [2, 0], sizes = [1, 16], strides = [1, 1]} : vector<3x16xf32> to vector<1x16xf32>
    %26 = vector.broadcast %24 : vector<16x1xf32> to vector<16x16xf32>
    %27 = vector.broadcast %25 : vector<1x16xf32> to vector<16x16xf32>
    %28 = arith.subf %26, %27 : vector<16x16xf32>
    %29 = arith.mulf %28, %28 : vector<16x16xf32>
    %30 = arith.addf %23, %29 : vector<16x16xf32>
    %cst_8 = arith.constant 0.000000e+00 : f32
    %31 = vector.broadcast %cst_8 : f32 to vector<16x16xf32>
    %cst_9 = arith.constant 0.000000e+00 : f32
    %32 = vector.broadcast %cst_9 : f32 to vector<16x1xf32>
    %cst_10 = arith.constant dense<0x7F800000> : vector<16xf32>
    %33 = vector.multi_reduction <minimumf>, %30, %cst_10 [1] : vector<16x16xf32> to vector<16xf32>
    %34 = vector.shape_cast %33 : vector<16xf32> to vector<16x1xf32>
    %35 = vector.broadcast %34 : vector<16x1xf32> to vector<16x16xf32>
    %36 = arith.cmpf ole, %30, %35 : vector<16x16xf32>
    %cst_11 = arith.constant 1.000000e-16 : f32
    %37 = vector.broadcast %cst_11 : f32 to vector<16x1xf32>
    %38 = arith.maximumf %34, %37 : vector<16x1xf32>
    %cst_12 = arith.constant 1.000000e+00 : f32
    %39 = vector.broadcast %cst_12 : f32 to vector<16x1xf32>
    %40 = arith.divf %39, %38 : vector<16x1xf32>
    %cst_13 = arith.constant 0.000000e+00 : f32
    %41 = vector.shape_cast %40 : vector<16x1xf32> to vector<16x1xf32>
    %42 = vector.broadcast %41 : vector<16x1xf32> to vector<16x16xf32>
    %43 = vector.broadcast %cst_13 : f32 to vector<16x16xf32>
    %44 = arith.select %36, %42, %43 : vector<16x16xi1>, vector<16x16xf32>
    %45 = arith.addf %31, %44 : vector<16x16xf32>
    %46 = arith.addf %32, %40 : vector<16x1xf32>
    %cst_14 = arith.constant 1.000000e+30 : f32
    %47 = vector.broadcast %cst_14 : f32 to vector<16x16xf32>
    %48 = arith.select %36, %47, %30 : vector<16x16xi1>, vector<16x16xf32>
    %cst_15 = arith.constant dense<0x7F800000> : vector<16xf32>
    %49 = vector.multi_reduction <minimumf>, %48, %cst_15 [1] : vector<16x16xf32> to vector<16xf32>
    %50 = vector.shape_cast %49 : vector<16xf32> to vector<16x1xf32>
    %51 = vector.broadcast %50 : vector<16x1xf32> to vector<16x16xf32>
    %52 = arith.cmpf ole, %48, %51 : vector<16x16xf32>
    %cst_16 = arith.constant 1.000000e-16 : f32
    %53 = vector.broadcast %cst_16 : f32 to vector<16x1xf32>
    %54 = arith.maximumf %50, %53 : vector<16x1xf32>
    %cst_17 = arith.constant 1.000000e+00 : f32
    %55 = vector.broadcast %cst_17 : f32 to vector<16x1xf32>
    %56 = arith.divf %55, %54 : vector<16x1xf32>
    %cst_18 = arith.constant 0.000000e+00 : f32
    %57 = vector.shape_cast %56 : vector<16x1xf32> to vector<16x1xf32>
    %58 = vector.broadcast %57 : vector<16x1xf32> to vector<16x16xf32>
    %59 = vector.broadcast %cst_18 : f32 to vector<16x16xf32>
    %60 = arith.select %52, %58, %59 : vector<16x16xi1>, vector<16x16xf32>
    %61 = arith.addf %45, %60 : vector<16x16xf32>
    %62 = arith.addf %46, %56 : vector<16x1xf32>
    %cst_19 = arith.constant 1.000000e+30 : f32
    %63 = vector.broadcast %cst_19 : f32 to vector<16x16xf32>
    %64 = arith.select %52, %63, %48 : vector<16x16xi1>, vector<16x16xf32>
    %cst_20 = arith.constant dense<0x7F800000> : vector<16xf32>
    %65 = vector.multi_reduction <minimumf>, %64, %cst_20 [1] : vector<16x16xf32> to vector<16xf32>
    %66 = vector.shape_cast %65 : vector<16xf32> to vector<16x1xf32>
    %67 = vector.broadcast %66 : vector<16x1xf32> to vector<16x16xf32>
    %68 = arith.cmpf ole, %64, %67 : vector<16x16xf32>
    %cst_21 = arith.constant 1.000000e-16 : f32
    %69 = vector.broadcast %cst_21 : f32 to vector<16x1xf32>
    %70 = arith.maximumf %66, %69 : vector<16x1xf32>
    %cst_22 = arith.constant 1.000000e+00 : f32
    %71 = vector.broadcast %cst_22 : f32 to vector<16x1xf32>
    %72 = arith.divf %71, %70 : vector<16x1xf32>
    %cst_23 = arith.constant 0.000000e+00 : f32
    %73 = vector.shape_cast %72 : vector<16x1xf32> to vector<16x1xf32>
    %74 = vector.broadcast %73 : vector<16x1xf32> to vector<16x16xf32>
    %75 = vector.broadcast %cst_23 : f32 to vector<16x16xf32>
    %76 = arith.select %68, %74, %75 : vector<16x16xi1>, vector<16x16xf32>
    %77 = arith.addf %61, %76 : vector<16x16xf32>
    %78 = arith.addf %62, %72 : vector<16x1xf32>
    %c0_24 = arith.constant 0 : index
    %c0_25 = arith.constant 0 : index
    %79 = vector.load %arg6[%c0_24, %c0_25] : memref<16x128xf32, #tpu.memory_space<vmem>>, vector<16x128xf32>
    %cst_26 = arith.constant dense<0.000000e+00> : vector<16x128xf32>
    %80 = tpu.matmul %77, %79, %cst_26 {dimension_numbers = #tpu.dot_dimension_numbers<[1], [0], [0], [1], [0, 0, 1, 1], [], []>} : vector<16x16xf32>, vector<16x128xf32>, vector<16x128xf32> -> vector<16x128xf32>
    %cst_27 = arith.constant 1.000000e-30 : f32
    %81 = vector.broadcast %cst_27 : f32 to vector<16x1xf32>
    %82 = arith.maximumf %78, %81 : vector<16x1xf32>
    %cst_28 = arith.constant 1.000000e+00 : f32
    %83 = vector.broadcast %cst_28 : f32 to vector<16x1xf32>
    %84 = arith.divf %83, %82 : vector<16x1xf32>
    %c0_29 = arith.constant 0 : index
    %c0_30 = arith.constant 0 : index
    %85 = vector.load %arg3[%c0_29, %c0_30] : memref<16x4xf32, #tpu.memory_space<vmem>>, vector<16x4xf32>
    %c0_31 = arith.constant 0 : index
    %c0_32 = arith.constant 0 : index
    %86 = vector.load %arg8[%c0_31, %c0_32] : memref<4x128xf32, #tpu.memory_space<vmem>>, vector<4x128xf32>
    %cst_33 = arith.constant dense<0.000000e+00> : vector<16x128xf32>
    %87 = tpu.matmul %85, %86, %cst_33 {dimension_numbers = #tpu.dot_dimension_numbers<[1], [0], [0], [1], [0, 0, 1, 1], [], []>} : vector<16x4xf32>, vector<4x128xf32>, vector<16x128xf32> -> vector<16x128xf32>
    %88 = vector.broadcast %84 : vector<16x1xf32> to vector<16x128xf32>
    %89 = arith.mulf %80, %88 : vector<16x128xf32>
    %90 = arith.addf %89, %87 : vector<16x128xf32>
    %c0_34 = arith.constant 0 : index
    %c0_35 = arith.constant 0 : index
    %91 = vector.load %arg9[%c0_34, %c0_35] : memref<1x128xf32, #tpu.memory_space<vmem>>, vector<1x128xf32>
    %92 = vector.broadcast %91 : vector<1x128xf32> to vector<16x128xf32>
    %93 = arith.addf %90, %92 : vector<16x128xf32>
    %cst_36 = arith.constant 0.000000e+00 : f32
    %94 = vector.broadcast %cst_36 : f32 to vector<16x128xf32>
    %95 = arith.maximumf %93, %94 : vector<16x128xf32>
    %c0_37 = arith.constant 0 : index
    %c0_38 = arith.constant 0 : index
    %96 = vector.load %arg10[%c0_37, %c0_38] : memref<128x128xf32, #tpu.memory_space<vmem>>, vector<128x128xf32>
    %cst_39 = arith.constant dense<0.000000e+00> : vector<16x128xf32>
    %97 = tpu.matmul %95, %96, %cst_39 {dimension_numbers = #tpu.dot_dimension_numbers<[1], [0], [0], [1], [0, 0, 1, 1], [], []>} : vector<16x128xf32>, vector<128x128xf32>, vector<16x128xf32> -> vector<16x128xf32>
    %c0_40 = arith.constant 0 : index
    %c0_41 = arith.constant 0 : index
    %98 = vector.load %arg11[%c0_40, %c0_41] : memref<1x128xf32, #tpu.memory_space<vmem>>, vector<1x128xf32>
    %99 = vector.broadcast %98 : vector<1x128xf32> to vector<16x128xf32>
    %100 = arith.addf %97, %99 : vector<16x128xf32>
    %c0_42 = arith.constant 0 : index
    %c0_43 = arith.constant 0 : index
    %101 = vector.load %arg12[%c0_42, %c0_43] : memref<16x128xf32, #tpu.memory_space<vmem>>, vector<16x128xf32>
    tpu.vector_store %arg12[%c0_42, %c0_43], %100 {strides = array<i32>} : memref<16x128xf32, #tpu.memory_space<vmem>>, vector<16x128xf32>,
    return
  }
  func.func @transform_0(%arg0: i32) -> (i32, i32) {
    %c0_i32 = arith.constant 0 : i32
    %c0_i32_0 = arith.constant 0 : i32
    return %arg0, %c0_i32 : i32, i32
  }
  func.func @transform_1(%arg0: i32) -> (i32, i32) {
    %c0_i32 = arith.constant 0 : i32
    %c0_i32_0 = arith.constant 0 : i32
    return %arg0, %c0_i32 : i32, i32
  }
  func.func @transform_2(%arg0: i32) -> (i32, i32) {
    %c0_i32 = arith.constant 0 : i32
    %c0_i32_0 = arith.constant 0 : i32
    return %arg0, %c0_i32 : i32, i32
  }
  func.func @transform_3(%arg0: i32) -> (i32, i32) {
    %c0_i32 = arith.constant 0 : i32
    %c0_i32_0 = arith.constant 0 : i32
    %c0_i32_1 = arith.constant 0 : i32
    return %c0_i32, %c0_i32_0 : i32, i32
  }
  func.func @transform_4(%arg0: i32) -> (i32, i32) {
    %c0_i32 = arith.constant 0 : i32
    %c0_i32_0 = arith.constant 0 : i32
    %c0_i32_1 = arith.constant 0 : i32
    return %c0_i32, %c0_i32_0 : i32, i32
  }
  func.func @transform_5(%arg0: i32) -> (i32, i32) {
    %c0_i32 = arith.constant 0 : i32
    %c0_i32_0 = arith.constant 0 : i32
    %c0_i32_1 = arith.constant 0 : i32
    return %c0_i32, %c0_i32_0 : i32, i32
  }
  func.func @transform_6(%arg0: i32) -> (i32, i32) {
    %c0_i32 = arith.constant 0 : i32
    %c0_i32_0 = arith.constant 0 : i32
    %c0_i32_1 = arith.constant 0 : i32
    return %c0_i32, %c0_i32_0 : i32, i32
  }
  func.func @transform_7(%arg0: i32) -> (i32, i32) {
    %c0_i32 = arith.constant 0 : i32
    %c0_i32_0 = arith.constant 0 : i32
    %c0_i32_1 = arith.constant 0 : i32
    return %c0_i32, %c0_i32_0 : i32, i32
  }
  func.func @transform_8(%arg0: i32) -> (i32, i32) {
    %c0_i32 = arith.constant 0 : i32
    %c0_i32_0 = arith.constant 0 : i32
    %c0_i32_1 = arith.constant 0 : i32
    return %c0_i32, %c0_i32_0 : i32, i32
  }
  func.func @transform_9(%arg0: i32) -> (i32, i32) {
    %c0_i32 = arith.constant 0 : i32
    %c0_i32_0 = arith.constant 0 : i32
    %c0_i32_1 = arith.constant 0 : i32
    return %c0_i32, %c0_i32_0 : i32, i32
  }
  func.func @transform_10(%arg0: i32) -> (i32, i32) {
    %c0_i32 = arith.constant 0 : i32
    %c0_i32_0 = arith.constant 0 : i32
    %c0_i32_1 = arith.constant 0 : i32
    return %c0_i32, %c0_i32_0 : i32, i32
  }
  func.func @transform_11(%arg0: i32) -> (i32, i32) {
    %c0_i32 = arith.constant 0 : i32
    %c0_i32_0 = arith.constant 0 : i32
    return %arg0, %c0_i32 : i32, i32
  }
}

</mosaic_0001>

<bundles_post_ra>
// kernel: fp_module_forward.1
= control target key start
LH: loop header
LB: loop body
LE: loop exit
PB: predicated region body
PF: predicated region fallthrough
CT: control target
= control target key end

     0   :  { %s1184_s17 = smov 0   ;;  %s1308_s0 = inlined_call_operand.vmem [shape: f32[32,3], index: 0, kind: input, shape index: {}]   ;;  %s1309_s1 = inlined_call_operand.vmem [shape: s32[32,1], index: 1, kind: input, shape index: {}]   ;;  %s1310_s2 = inlined_call_operand.vmem [shape: f32[32,4], index: 2, kind: input, shape index: {}]   ;;  %s1311_s3 = inlined_call_operand.vmem [shape: f32[3,16], index: 3, kind: input, shape index: {}]   ;;  %s1312_s4 = inlined_call_operand.vmem [shape: s32[1,16], index: 4, kind: input, shape index: {}]   ;;  %s1313_s5 = inlined_call_operand.vmem [shape: f32[16,128], index: 5, kind: input, shape index: {}]   ;;  %s1314_s6 = inlined_call_operand.vmem [shape: f32[8,128], index: 6, kind: input, shape index: {}]   ;;  %s1315_s7 = inlined_call_operand.vmem [shape: f32[4,128], index: 7, kind: input, shape index: {}]   ;;  %s1316_s8 = inlined_call_operand.vmem [shape: f32[1,128], index: 8, kind: input, shape index: {}]   ;;  %s1317_s9 = inlined_call_operand.vmem [shape: f32[128,128], index: 9, kind: input, shape index: {}]   ;;  %s1318_s10 = inlined_call_operand.vmem [shape: f32[1,128], index: 10, kind: input, shape index: {}]   ;;  %s1319_s11 = inlined_call_operand.vmem [shape: f32[32,128], index: 11, kind: output, shape index: {}]  }
   0x1 LB: > { %s948_s6 = sadd.s32 4294967295, %s1118_s17   ;;  %p952_p0 = scmp.ge.s32.totalorder %s1118_s17, 1  ;;  %s1118_s17 = sphi %s1184_s17, %s21_s17  }
   0x2   : > { %p360_p1 = scmp.lt.s32.totalorder %s1118_s17, 3 }
   0x4   : > { %p361_p2 = pnand %p952_p0, %p360_p1 }
   0x5   : > { %s953_s18 = sshll.u32 (!%p361_p2), %s948_s6, 1  ;;  %v1120_v0 = vmov (!%p361_p2), 0   ;;  %v1121_v4 = vmov (!%p361_p2), 1   ;;  %v1122_v6 = vmov (!%p361_p2), 2   ;;  %v464_v7 = vlaneseq (!%p361_p2)  ;;  %v453_v10 = vld [vmem:[%s1311_s3] sm:$0x7] (!%p361_p2) }
   0x6   : > { %364 = sbr.rel (%p361_p2) target bundleno = 1055 (0x41f), region = 64  ;;  %1092 = vset.pattern.permute.xlu1 (!%p361_p2), %v1120_v0  ;;  %1091 = vset.pattern.permute.xlu0 (!%p361_p2), %v1120_v0  ;;  %p411_p3 = scmp.lt.s32.totalorder (!%p361_p2), %s953_s18, 3  ;;  %v961_v20 = vld [vmem:[%s1312_s4] ss:$0 sm:$0xff] (!%p361_p2)  ;;  %v1123_v27 = vmov (!%p361_p2), 1e+30  }
   0x7   : > { %v465_v8 = vshrl.u32 (!%p361_p2), %v464_v7, 7  ;;  %vm510_vm2 = vcmask (!%p361_p2), 130048   ;;  %vm674_vm7 = vcmask (!%p361_p2), 1043456   ;;  %vm667_vm10 = vcmask (!%p361_p2), 31744  }
   0x9   : > { %v466_v9 = vsub.s32 (!%p361_p2), 0, %v465_v8  ;;  %v484_v13 = vsub.s32 (!%p361_p2), 1, %v465_v8  ;;  %v502_v18 = vsub.s32 (!%p361_p2), 2, %v465_v8 }
   0xb   : > { %v467_v14 = vrot.slane (!%p361_p2), %v453_v10, %v466_v9  ;;  %v485_v16 = vrot.slane (!%p361_p2), %v453_v10, %v484_v13  ;;  %v503_v25 = vrot.slane (!%p361_p2), %v453_v10, %v502_v18  ;;  %v575_v10 = vld [vmem:[%s1313_s5] sm:$0xff] (!%p361_p2)  ;;  %v771_v18 = vld [vmem:[%s1317_s9 + $0x18] sm:$0xff] (!%p361_p2) }
   0xc   : > { %v666_v13 = vld [vmem:[%s1315_s7] sm:$0xf] (!%p361_p2) }
   0xd   : > { %s1321_s18 = smov (!%p411_p3, %s953_s18), 3 }
   0xe   : > { %s1192_s19 = sshll.u32 %s1321_s18, 3 }
   0xf   : > { %s420_s22 = scalar_lea.vmem %s1309_s1, %s1192_s19  ;;  %s414_s25 = scalar_lea.vmem %s1308_s0, %s1192_s19 }
  0x10   : > { %v434_v1 = vld [vmem:[%s420_s22] sm:$0xff]  ;;  %v452_v3 = vld [vmem:[%s414_s25 + $0x8] sm:$0xff]  ;;  %s432_s23 = scalar_lea.vmem %s1319_s11, %s1192_s19 }
  0x11   : > { %v451_v2 = vld [vmem:[%s414_s25] sm:$0xff]  ;;  %438 = vperm.xlu1 %1092, %v434_v1   ;;  %v435_v5 = vld [vmem:[%s420_s22 + $0x8] sm:$0xff]  ;;  %s426_s22 = scalar_lea.vmem %s1310_s2, %s1192_s19 }
  0x12   : > { %456 = vperm.xlu0 %1091, %v451_v2  }
  0x15   : > { %1093 = vset.pattern.permute.xlu1 %v1121_v4 }
  0x16   : > { %461 = vperm.xlu0 %1091, %v452_v3   ;;  %475 = vperm.xlu1 %1093, %v451_v2  }
  0x1a   : > { %441 = vperm.xlu0 %1091, %v435_v5   ;;  %479 = vperm.xlu1 %1093, %v452_v3  }
  0x1e   : > { %1094 = vset.pattern.permute.xlu0 %v1122_v6  ;;  %1095 = vset.pattern.permute.xlu1 %v1122_v6 }
  0x1f   : > { %493 = vperm.xlu0 %1094, %v451_v2   ;;  %497 = vperm.xlu1 %1095, %v452_v3  }
  0x90   : > { %v439_v11 = vpop.permute.xlu1 %438 }
  0x91   : > { %v457_v12 = vpop.permute.xlu0 %456  ;;  %vm447_vm1 = vcmp.eq.s32.totalorder %v439_v11, %v961_v20  ;;  %v576_v11 = vld [vmem:[%s1313_s5 + $0x8] sm:$0xff] }
  0x92   : > { %v468_v19 = vsub.f32 %v457_v12, %v467_v14  ;;  %v449_v32 = vsel %vm447_vm1, 0.0, %v1123_v27  ;;  %v1043_v12 = vpack.c.bf16 %v576_v11, %v575_v10 }
  0x94   : > { %v470_v26 = vmul.f32 %v468_v19, %v468_v19  ;;  %1044 = vmatprep.subr.bf16.mxu0 %v1043_v12 }
  0x95   : > { %v462_v15 = vpop.permute.xlu0 %461  ;;  %v476_v17 = vpop.permute.xlu1 %475  ;;  %1046 = vmatpush3.bf16.msra.mxu0 %v1043_v12 }
  0x96   : > { %v469_v21 = vsub.f32 %v462_v15, %v467_v14  ;;  %v486_v22 = vsub.f32 %v476_v17, %v485_v16  ;;  %v472_v36 = vadd.f32 %v470_v26, %v449_v32  ;;  %1003 = vmatprep.subr.msk.mxu0 %vm674_vm7, %v666_v13  ;;  %v768_v14 = vld [vmem:[%s1317_s9] sm:$0xff]  ;;  %v769_v15 = vld [vmem:[%s1317_s9 + $0x8] sm:$0xff] }
  0x97   : > { %v1047_v17 = vpack.c.bf16 %v769_v15, %v768_v14  ;;  %v776_v26 = vld [vmem:[%s1317_s9 + $0x40] sm:$0xff] }
  0x98   : > { %v471_v30 = vmul.f32 %v469_v21, %v469_v21  ;;  %v488_v31 = vmul.f32 %v486_v22, %v486_v22  ;;  %v773_v21 = vld [vmem:[%s1317_s9 + $0x28] sm:$0xff] }
  0x99   : > { %v442_v23 = vpop.permute.xlu0 %441  ;;  %v480_v24 = vpop.permute.xlu1 %479  ;;  %1048 = vmatprep.subr.bf16.mxu1 %v1047_v17 }
  0x9a   : > { %vm448_vm0 = vcmp.eq.s32.totalorder %v442_v23, %v961_v20  ;;  %v487_v29 = vsub.f32 %v480_v24, %v485_v16  ;;  %v490_v40 = vadd.f32 %v488_v31, %v472_v36  ;;  %v770_v16 = vld [vmem:[%s1317_s9 + $0x10] sm:$0xff]  ;;  %v772_v20 = vld [vmem:[%s1317_s9 + $0x20] sm:$0xff]  ;;  %1050 = vmatpush3.bf16.msra.mxu1 %v1047_v17  ;;  %v775_v24 = vld [vmem:[%s1317_s9 + $0x38] sm:$0xff] }
  0x9b   : > { %v450_v28 = vsel %vm448_vm0, 0.0, %v1123_v27  ;;  %v1051_v19 = vpack.c.bf16 %v771_v18, %v770_v16  ;;  %v1055_v22 = vpack.c.bf16 %v773_v21, %v772_v20  ;;  %v774_v23 = vld [vmem:[%s1317_s9 + $0x30] sm:$0xff]  ;;  %v777_v27 = vld [vmem:[%s1317_s9 + $0x48] sm:$0xff] }
  0x9c   : > { %v473_v33 = vadd.f32 %v471_v30, %v450_v28  ;;  %v489_v34 = vmul.f32 %v487_v29, %v487_v29  ;;  %v1063_v28 = vpack.c.bf16 %v777_v27, %v776_v26 }
  0x9d   : > { %1052 = vmatprep.subr.bf16.mxu1 %v1051_v19 }
  0x9e   : > { %v494_v35 = vpop.permute.xlu0 %493  ;;  %v498_v38 = vpop.permute.xlu1 %497  ;;  %v491_v42 = vadd.f32 %v489_v34, %v473_v33  ;;  %1054 = vmatpush3.bf16.msra.mxu1 %v1051_v19 }
  0x9f   : > { %v504_v37 = vsub.f32 %v494_v35, %v503_v25  ;;  %v505_v39 = vsub.f32 %v498_v38, %v503_v25  ;;  %1056 = vmatprep.subr.bf16.mxu1 %v1055_v22  ;;  %v1059_v25 = vpack.c.bf16 %v775_v24, %v774_v23 }
  0xa1   : > { %v506_v41 = vmul.f32 %v504_v37, %v504_v37  ;;  %v507_v43 = vmul.f32 %v505_v39, %v505_v39 }
  0xa2   : > { %1058 = vmatpush3.bf16.msra.mxu1 %v1055_v22 }
  0xa3   : > { %v508_v44 = vadd.f32 %v506_v41, %v490_v40  ;;  %v509_v45 = vadd.f32 %v507_v43, %v491_v42  ;;  %1060 = vmatprep.subr.bf16.mxu1 %v1059_v25  ;;  %v664_v43 = vld [vmem:[%s426_s22] sm:$0xff] }
  0xa5   : > { %v511_v46 = vsel %vm510_vm2, %v508_v44, inf  ;;  %v514_v47 = vsel %vm510_vm2, %v509_v45, inf }
  0xa6   : > { %512 = vmin.xlane.f32.xlu1 %v511_v46  ;;  %515 = vmin.xlane.f32.xlu0 %v514_v47  ;;  %v779_v46 = vld [vmem:[%s1317_s9 + $0x58] sm:$0xff] }
  0xa7   : > { %1062 = vmatpush3.bf16.msra.mxu1 %v1059_v25 }
  0xa8   : > { %1064 = vmatprep.subr.bf16.mxu1 %v1063_v28 }
  0xab   : > { %1066 = vmatpush3.bf16.msra.mxu1 %v1063_v28 }
 0x133   : > { %v513_v48 = vpop.xlane.xlu1 %512  ;;  %v516_v49 = vpop.xlane.xlu0 %515 }
 0x134   : > { %vm517_vm3 = vcmp.le.f32.partialorder %v508_v44, %v513_v48  ;;  %vm518_vm4 = vcmp.le.f32.partialorder %v509_v45, %v516_v49  ;;  %v519_v54 = vmax.f32 %v513_v48, 1e-16  ;;  %v520_v55 = vmax.f32 %v516_v49, 1e-16  ;;  %v780_v48 = vld [vmem:[%s1317_s9 + $0x60] sm:$0xff]  ;;  %v781_v49 = vld [vmem:[%s1317_s9 + $0x68] sm:$0xff] }
 0x135   : > { %v531_v50 = vsel %vm517_vm3, 1e+30, %v508_v44  ;;  %v532_v52 = vsel %vm518_vm4, 1e+30, %v509_v45  ;;  %v665_v44 = vld [vmem:[%s426_s22 + $0x8] sm:$0xff]  ;;  %v778_v45 = vld [vmem:[%s1317_s9 + $0x50] sm:$0xff] }
 0x136   : > { %v533_v51 = vsel %vm510_vm2, %v531_v50, inf  ;;  %v536_v53 = vsel %vm510_vm2, %v532_v52, inf  ;;  %1096 = vrcp.f32 %v519_v54  ;;  %v1067_v47 = vpack.c.bf16 %v779_v46, %v778_v45 }
 0x137   : > { %534 = vmin.xlane.f32.xlu0 %v533_v51  ;;  %537 = vmin.xlane.f32.xlu1 %v536_v53  ;;  %1098 = vrcp.f32 %v520_v55  ;;  %v782_v51 = vld [vmem:[%s1317_s9 + $0x70] sm:$0xff] }
 0x138   : > { %1068 = vmatprep.subr.bf16.mxu1 %v1067_v47 }
 0x139   : > { %1070 = vmatpush3.bf16.msra.mxu1 %v1067_v47 }
 0x140   : > { %v1097_v0 = vpop.eup %1096 }
 0x141   : > { %v1099_v1 = vpop.eup %1098  ;;  %v525_v4 = vsel %vm517_vm3, %v1097_v0, 0.0 }
 0x142   : > { %v526_v6 = vsel %vm518_vm4, %v1099_v1, 0.0 }
 0x1c4   : > { %v535_v56 = vpop.xlane.xlu0 %534  ;;  %v538_v58 = vpop.xlane.xlu1 %537 }
 0x1c5   : > { %vm539_vm5 = vcmp.le.f32.partialorder %v531_v50, %v535_v56  ;;  %v541_v57 = vmax.f32 %v535_v56, 1e-16  ;;  %vm540_vm6 = vcmp.le.f32.partialorder %v532_v52, %v538_v58  ;;  %v542_v59 = vmax.f32 %v538_v58, 1e-16 }
 0x1c6   : > { %v1215_v60 = vsel %vm539_vm5, 1e+30, %v531_v50  ;;  %v1220_v62 = vsel %vm540_vm6, 1e+30, %v532_v52  ;;  %v1071_v50 = vpack.c.bf16 %v781_v49, %v780_v48  ;;  %v783_v52 = vld [vmem:[%s1317_s9 + $0x78] sm:$0xff] }
 0x1c7   : > { %1100 = vrcp.f32 %v541_v57  ;;  %v555_v61 = vsel %vm510_vm2, %v1215_v60, inf  ;;  %v558_v63 = vsel %vm510_vm2, %v1220_v62, inf  ;;  %v1075_v53 = vpack.c.bf16 %v783_v52, %v782_v51 }
 0x1c8   : > { %1102 = vrcp.f32 %v542_v59  ;;  %556 = vmin.xlane.f32.xlu0 %v555_v61  ;;  %559 = vmin.xlane.f32.xlu1 %v558_v63  ;;  %v967_v63 = vld [vmem:[%s1316_s8] ss:$0 sm:$0xff] }
 0x1c9   : > { %1072 = vmatprep.subr.bf16.mxu1 %v1071_v50 }
 0x1ca   : > { %1074 = vmatpush3.bf16.msra.mxu1 %v1071_v50 }
 0x1cb   : > { %1076 = vmatprep.subr.bf16.mxu1 %v1075_v53 }
 0x1ce   : > { %1078 = vmatpush3.bf16.msra.mxu1 %v1075_v53 }
 0x1d1   : > { %v1101_v2 = vpop.eup %1100 }
 0x1d2   : > { %v1103_v3 = vpop.eup %1102  ;;  %v547_v5 = vsel %vm539_vm5, %v1101_v2, 0.0  ;;  %v551_v33 = vadd.f32 %v1101_v2, %v1097_v0 }
 0x1d3   : > { %v548_v7 = vsel %vm540_vm6, %v1103_v3, 0.0  ;;  %v549_v8 = vadd.f32 %v547_v5, %v525_v4  ;;  %v552_v35 = vadd.f32 %v1103_v3, %v1099_v1 }
 0x1d4   : > { %v550_v9 = vadd.f32 %v548_v7, %v526_v6  ;;  %v968_v7 = vld [vmem:[%s1318_s10] ss:$0 sm:$0xff] }
 0x255   : > { %v557_v29 = vpop.xlane.xlu0 %556  ;;  %v560_v31 = vpop.xlane.xlu1 %559 }
 0x256   : > { %v563_v30 = vmax.f32 %v557_v29, 1e-16  ;;  %v564_v32 = vmax.f32 %v560_v31, 1e-16  ;;  %vm561_vm8 = vcmp.le.f32.partialorder %v1215_v60, %v557_v29  ;;  %vm562_vm9 = vcmp.le.f32.partialorder %v1220_v62, %v560_v31 }
 0x258   : > { %1104 = vrcp.f32 %v563_v30 }
 0x259   : > { %1106 = vrcp.f32 %v564_v32 }
 0x262   : > { %v1105_v34 = vpop.eup %1104 }
 0x263   : > { %v1107_v36 = vpop.eup %1106  ;;  %v569_v37 = vsel %vm561_vm8, %v1105_v34, 0.0  ;;  %v573_v38 = vadd.f32 %v1105_v34, %v551_v33 }
 0x264   : > { %v570_v39 = vsel %vm562_vm9, %v1107_v36, 0.0  ;;  %v574_v40 = vadd.f32 %v1107_v36, %v552_v35  ;;  %v571_v41 = vadd.f32 %v569_v37, %v549_v8 }
 0x265   : > { %v572_v42 = vadd.f32 %v570_v39, %v550_v9  ;;  %v658_v55 = vmax.f32 %v573_v38, 1e-30 }
 0x266   : > { %1000 = vmatprep.mubr.msk.f32.mxu0 %vm510_vm2, %v571_v41  ;;  %v659_v54 = vmax.f32 %v574_v40, 1e-30 }
 0x267   : > { %1001 = vmatmul.mubr.msk.f32.vlgmr.msra.gmra.mrb[0].mxu0 %vm510_vm2, %v572_v42 }
 0x268   : > { %1004 = vmatpush3.msk.msra.mxu0 %vm674_vm7, %v666_v13  ;;  %1005 = vmatprep.mubr.msk.f32.mxu0 %vm667_vm10, %v664_v43  ;;  %1108 = vrcp.f32 %v659_v54 }
 0x269   : > { %1110 = vrcp.f32 %v658_v55 }
 0x26b   : > { %1006 = vmatmul.mubr.msk.f32.vlgmr.msra.gmra.mrb[2].mxu0 %vm667_vm10, %v665_v44 }
 0x272   : > { %v1109_v56 = vpop.eup %1108 }
 0x273   : > { %v1111_v58 = vpop.eup %1110 }
 0x33a   : > { %v1002_v57 = vpop.f32.mrb[0].mxu0 }
 0x33b   : > { %v754_v59 = vmul.f32 %v1109_v56, %v1002_v57  ;;  %v649_v60 = vpop.f32.mrb[1].mxu0 }
 0x33c   : > { %v753_v61 = vmul.f32 %v1111_v58, %v649_v60 }
 0x33e   : > { %v1007_v62 = vpop.f32.mrb[2].mxu0 }
 0x33f   : > { %v756_v0 = vadd.f32 %v1007_v62, %v754_v59  ;;  %v744_v1 = vpop.f32.mrb[3].mxu0 }
 0x340   : > { %v755_v2 = vadd.f32 %v753_v61, %v744_v1 }
 0x341   : > { %v765_v3 = vadd.f32 %v967_v63, %v756_v0 }
 0x342   : > { %v764_v4 = vadd.f32 %v967_v63, %v755_v2 }
 0x343   : > { %v767_v6 = vmax.f32 %v765_v3, 0.0 }
 0x344   : > { %v766_v5 = vmax.f32 %v764_v4, 0.0 }
 0x346   : > { %1040 = vmatprep.mubr.f32.mxu1 %v766_v5 }
 0x347   : > { %1041 = vmatmul.mubr.f32.vlgmr.msra.gmra.mrb[0].mxu1 %v767_v6 }
 0x41a   : > { %v1042_v8 = vpop.f32.mrb[0].mxu1 }
 0x41b   : > { %v857_v9 = vpop.f32.mrb[1].mxu1  ;;  %v863_v11 = vadd.f32 %v1042_v8, %v968_v7 }
 0x41c   : > { %v858_v10 = vadd.f32 %v968_v7, %v857_v9 }
 0x41d   : > { %867 = vst [vmem:[%s432_s23 + $0x8] sm:$0xff] %v863_v11 }
 0x41e   : > { %866 = vst [vmem:[%s432_s23] sm:$0xff] %v858_v10 }
 0x41f PF: > { %s21_s17 = sadd.s32 1, %s1118_s17  }
 0x420   : > { %p18_p4 = scmp.ge.s32.totalorder %s21_s17, 4  }
 0x422   :  { %20 = sbr.rel (!%p18_p4) target bundleno = 1 (0x1), region = 100 }

</bundles_post_ra>
